<compile_context>
chip_gen: v7x
topology: tpu7x:2x2x1
jax: 0.10.0
libtpu: 0.0.40
codegen_flags: <defaults>
</compile_context>

<pallas_src>
import jax
import jax.numpy as jnp
from jax.experimental import pallas as pl
from jax.experimental.pallas import tpu as pltpu


def _mlp_head_kernel(x_ref, w1_ref, b1_ref, w2_ref, b2_ref, w3_ref, b3_ref, o_ref):
    # x_ref: [bt, D] (same dtype as w1); w1 [D,H]; w2 [H,H]; b1/b2/w3 [1,H];
    # b3: (1,) scalar in SMEM; o_ref: [1, bt] (batch on the lane axis).

    # Layer 1: MXU matmul, f32 accumulation.
    h = jnp.dot(x_ref[...], w1_ref[...], preferred_element_type=jnp.float32)
    h = jnp.maximum(h + b1_ref[...].astype(jnp.float32), 0.0)

    # Layer 2: feed the MXU in the weight dtype (no-op cast for f32 params).
    h = jnp.dot(h.astype(w2_ref.dtype), w2_ref[...],
                preferred_element_type=jnp.float32)
    h = jnp.maximum(h + b2_ref[...].astype(jnp.float32), 0.0)

    # Layer 3 (H -> 1): VPU multiply + lane reduction; result laid out on lanes
    # so the final store is lane-dense. b3 is a scalar read from SMEM.
    logits = jnp.sum(h * w3_ref[...].astype(jnp.float32), axis=-1)  # [bt]
    row = logits[None, :] + b3_ref[0]                               # [1, bt]
    o_ref[...] = jax.nn.sigmoid(row).astype(o_ref.dtype)


def classification_head_forward(similarity, params, *, batch_tile=None):
    """similarity: [B, D]. params: w1[D,H], b1[1,H], w2[H,H], b2[1,H], w3[1,H], b3[1].

    Returns [B, 1] in the params' dtype (PyTorch ClassificationHead semantics)."""
    w1, b1 = params["w1"], params["b1"]
    w2, b2 = params["w2"], params["b2"]
    w3, b3 = params["w3"], params["b3"]

    # PyTorch: similarity = similarity.type(self.mlp[0].weight.dtype)
    similarity = similarity.astype(w1.dtype)
    B, D = similarity.shape

    if batch_tile is None:
        # >=128: lane-dense output stores + MXU/sublane friendly on v5e..v7x.
        # 512 for large B: amortizes the ~600-cycle per-step pipeline overhead
        # while keeping >=2 grid steps so both v7x TensorCores get work.
        batch_tile = 512 if B > 1024 else 128

    num_tiles = pl.cdiv(B, batch_tile)
    b_pad = num_tiles * batch_tile
    if b_pad != B:
        similarity = jnp.pad(similarity, ((0, b_pad - B), (0, 0)))

    full = lambda a: pl.BlockSpec(a.shape, lambda i: (0,) * a.ndim)

    out = pl.pallas_call(
        _mlp_head_kernel,
        out_shape=jax.ShapeDtypeStruct((1, b_pad), w1.dtype),
        grid_spec=pltpu.PrefetchScalarGridSpec(
            num_scalar_prefetch=0,
            grid=(num_tiles,),
            in_specs=[
                pl.BlockSpec((batch_tile, D), lambda i: (i, 0)),    # x tile
                full(w1), full(b1),
                full(w2), full(b2),
                full(w3),
                pl.BlockSpec(memory_space=pltpu.MemorySpace.SMEM),  # b3 scalar
            ],
            # Lane-dense output: batch on the lane axis, one row per call.
            out_specs=pl.BlockSpec((1, batch_tile), lambda i: (0, i)),
        ),
        compiler_params=pltpu.CompilerParams(
            dimension_semantics=("parallel",),
        ),
    )(similarity, w1, b1, w2, b2, w3, b3)

    # Back to the PyTorch output layout [B, 1] (drop batch padding).
    return out[0, :B][:, None]


def init_params(key, projection_size, hidden_size, dtype=jnp.float32):
    """nn.Linear-style init (uniform +/- 1/sqrt(fan_in)).
    w1/w2 stored [in, out]; w3 stored [1, hidden]; b3 stored as (1,) f32 (SMEM).
    Use dtype=jnp.bfloat16 on v6e/v7x to halve HBM traffic (accumulation stays f32)."""
    ks = jax.random.split(key, 6)

    def unif(k, shape, fan_in):
        bound = 1.0 / jnp.sqrt(fan_in)
        return jax.random.uniform(k, shape, jnp.float32, -bound, bound).astype(dtype)

    w1 = unif(ks[0], (projection_size, hidden_size), projection_size)
    b1 = unif(ks[1], (1, hidden_size), projection_size)
    w2 = unif(ks[2], (hidden_size, hidden_size), hidden_size)
    b2 = unif(ks[3], (1, hidden_size), hidden_size)
    w3 = unif(ks[4], (1, hidden_size), hidden_size)               # Linear(H->1) weight
    b3 = unif(ks[5], (1,), hidden_size).astype(jnp.float32)       # scalar bias
    return {"w1": w1, "b1": b1, "w2": w2, "b2": b2, "w3": w3, "b3": b3}


def _reference(similarity, params):
    x = similarity.astype(params["w1"].dtype).astype(jnp.float32)
    h = jnp.maximum(x @ params["w1"].astype(jnp.float32)
                    + params["b1"].astype(jnp.float32), 0.0)
    h = jnp.maximum(h @ params["w2"].astype(jnp.float32)
                    + params["b2"].astype(jnp.float32), 0.0)
    logits = h @ params["w3"].astype(jnp.float32).T + params["b3"]
    return jax.nn.sigmoid(logits).astype(params["w1"].dtype)


if __name__ == "__main__":
    # Small shapes consistent with the module: projection_size=64 (stand-in for
    # the CLIP text_projection width), hidden_size=128 (module default),
    # num_layers=3. B=200 is deliberately NOT a multiple of the batch tile to
    # exercise the padding path for arbitrary batch sizes.
    B, D, H = 200, 64, 128

    key = jax.random.PRNGKey(0)
    k_params, k_x = jax.random.split(key)
    params = init_params(k_params, D, H)

    # "similarity" features coming out of the CLIP model.
    similarity = jax.random.normal(k_x, (B, D), jnp.float32)

    out = classification_head_forward(similarity, params)
    out = jax.block_until_ready(out)

    ref = _reference(similarity, params)
    assert out.shape == (B, 1)
    assert jnp.allclose(out, ref, atol=1e-5, rtol=1e-5), float(jnp.max(jnp.abs(out - ref)))

    print("KERNEL_OK")
</pallas_src>

<mosaic_0001>
module attributes {stable_mosaic.version = 11 : i64} {
  func.func @_mlp_head_kernel(%arg0: i32, %arg1: memref<128x64xf32, #tpu.memory_space<vmem>>, %arg2: memref<64x128xf32, #tpu.memory_space<vmem>>, %arg3: memref<1x128xf32, #tpu.memory_space<vmem>>, %arg4: memref<128x128xf32, #tpu.memory_space<vmem>>, %arg5: memref<1x128xf32, #tpu.memory_space<vmem>>, %arg6: memref<1x128xf32, #tpu.memory_space<vmem>>, %arg7: memref<1xf32, #tpu.memory_space<smem>>, %arg8: memref<1x128xf32, #tpu.memory_space<vmem>>) attributes {dimension_semantics = [#tpu.dimension_semantics<parallel>], iteration_bounds = array<i64: 2>, scalar_prefetch = 0 : i64, scratch_operands = 0 : i64, tpu.core_type = #tpu.core_type<tc>, window_params = [{transform_indices = @transform_0, window_bounds = array<i64: 128, 64>}, {pipeline_mode = #tpu.pipeline_mode<synchronous>, transform_indices = @transform_1, window_bounds = array<i64: 64, 128>}, {pipeline_mode = #tpu.pipeline_mode<synchronous>, transform_indices = @transform_2, window_bounds = array<i64: 1, 128>}, {pipeline_mode = #tpu.pipeline_mode<synchronous>, transform_indices = @transform_3, window_bounds = array<i64: 128, 128>}, {pipeline_mode = #tpu.pipeline_mode<synchronous>, transform_indices = @transform_4, window_bounds = array<i64: 1, 128>}, {pipeline_mode = #tpu.pipeline_mode<synchronous>, transform_indices = @transform_5, window_bounds = array<i64: 1, 128>}, {transform_indices = @transform_6, window_bounds = array<i64: 1>}, {transform_indices = @transform_7, window_bounds = array<i64: 1, 128>}]} {
    %c0 = arith.constant 0 : index
    %c0_0 = arith.constant 0 : index
    %0 = vector.load %arg1[%c0, %c0_0] : memref<128x64xf32, #tpu.memory_space<vmem>>, vector<128x64xf32>
    %c0_1 = arith.constant 0 : index
    %c0_2 = arith.constant 0 : index
    %1 = vector.load %arg2[%c0_1, %c0_2] : memref<64x128xf32, #tpu.memory_space<vmem>>, vector<64x128xf32>
    %cst = arith.constant dense<0.000000e+00> : vector<128x128xf32>
    %2 = tpu.matmul %0, %1, %cst {dimension_numbers = #tpu.dot_dimension_numbers<[1], [0], [0], [1], [0, 0, 1, 1], [], []>} : vector<128x64xf32>, vector<64x128xf32>, vector<128x128xf32> -> vector<128x128xf32>
    %c0_3 = arith.constant 0 : index
    %c0_4 = arith.constant 0 : index
    %3 = vector.load %arg3[%c0_3, %c0_4] : memref<1x128xf32, #tpu.memory_space<vmem>>, vector<1x128xf32>
    %4 = vector.broadcast %3 : vector<1x128xf32> to vector<128x128xf32>
    %5 = arith.addf %2, %4 : vector<128x128xf32>
    %cst_5 = arith.constant 0.000000e+00 : f32
    %6 = vector.broadcast %cst_5 : f32 to vector<128x128xf32>
    %7 = arith.maximumf %5, %6 : vector<128x128xf32>
    %c0_6 = arith.constant 0 : index
    %c0_7 = arith.constant 0 : index
    %8 = vector.load %arg4[%c0_6, %c0_7] : memref<128x128xf32, #tpu.memory_space<vmem>>, vector<128x128xf32>
    %cst_8 = arith.constant dense<0.000000e+00> : vector<128x128xf32>
    %9 = tpu.matmul %7, %8, %cst_8 {dimension_numbers = #tpu.dot_dimension_numbers<[1], [0], [0], [1], [0, 0, 1, 1], [], []>} : vector<128x128xf32>, vector<128x128xf32>, vector<128x128xf32> -> vector<128x128xf32>
    %c0_9 = arith.constant 0 : index
    %c0_10 = arith.constant 0 : index
    %10 = vector.load %arg5[%c0_9, %c0_10] : memref<1x128xf32, #tpu.memory_space<vmem>>, vector<1x128xf32>
    %11 = vector.broadcast %10 : vector<1x128xf32> to vector<128x128xf32>
    %12 = arith.addf %9, %11 : vector<128x128xf32>
    %cst_11 = arith.constant 0.000000e+00 : f32
    %13 = vector.broadcast %cst_11 : f32 to vector<128x128xf32>
    %14 = arith.maximumf %12, %13 : vector<128x128xf32>
    %c0_12 = arith.constant 0 : index
    %c0_13 = arith.constant 0 : index
    %15 = vector.load %arg6[%c0_12, %c0_13] : memref<1x128xf32, #tpu.memory_space<vmem>>, vector<1x128xf32>
    %16 = vector.broadcast %15 : vector<1x128xf32> to vector<128x128xf32>
    %17 = arith.mulf %14, %16 : vector<128x128xf32>
    %cst_14 = arith.constant dense<0.000000e+00> : vector<128xf32>
    %18 = vector.multi_reduction <add>, %17, %cst_14 [1] : vector<128x128xf32> to vector<128xf32>
    %19 = vector.shape_cast %18 : vector<128xf32> to vector<1x128xf32>
    %c0_15 = arith.constant 0 : index
    %20 = memref.load %arg7[%c0_15] : memref<1xf32, #tpu.memory_space<smem>>
    %21 = vector.broadcast %20 : f32 to vector<1x128xf32>
    %22 = arith.addf %19, %21 : vector<1x128xf32>
    %23 = arith.negf %22 : vector<1x128xf32>
    %24 = math.exp %23 : vector<1x128xf32>
    %cst_16 = arith.constant 1.000000e+00 : f32
    %25 = vector.broadcast %cst_16 : f32 to vector<1x128xf32>
    %26 = arith.addf %25, %24 : vector<1x128xf32>
    %27 = arith.divf %25, %26 : vector<1x128xf32>
    %c0_17 = arith.constant 0 : index
    %c0_18 = arith.constant 0 : index
    %28 = vector.load %arg8[%c0_17, %c0_18] : memref<1x128xf32, #tpu.memory_space<vmem>>, vector<1x128xf32>
    tpu.vector_store %arg8[%c0_17, %c0_18], %27 {strides = array<i32>} : memref<1x128xf32, #tpu.memory_space<vmem>>, vector<1x128xf32>,
    return
  }
  func.func @transform_0(%arg0: i32) -> (i32, i32) {
    %c0_i32 = arith.constant 0 : i32
    %c0_i32_0 = arith.constant 0 : i32
    return %arg0, %c0_i32 : i32, i32
  }
  func.func @transform_1(%arg0: i32) -> (i32, i32) {
    %c0_i32 = arith.constant 0 : i32
    %c0_i32_0 = arith.constant 0 : i32
    %c0_i32_1 = arith.constant 0 : i32
    return %c0_i32, %c0_i32_0 : i32, i32
  }
  func.func @transform_2(%arg0: i32) -> (i32, i32) {
    %c0_i32 = arith.constant 0 : i32
    %c0_i32_0 = arith.constant 0 : i32
    %c0_i32_1 = arith.constant 0 : i32
    return %c0_i32, %c0_i32_0 : i32, i32
  }
  func.func @transform_3(%arg0: i32) -> (i32, i32) {
    %c0_i32 = arith.constant 0 : i32
    %c0_i32_0 = arith.constant 0 : i32
    %c0_i32_1 = arith.constant 0 : i32
    return %c0_i32, %c0_i32_0 : i32, i32
  }
  func.func @transform_4(%arg0: i32) -> (i32, i32) {
    %c0_i32 = arith.constant 0 : i32
    %c0_i32_0 = arith.constant 0 : i32
    %c0_i32_1 = arith.constant 0 : i32
    return %c0_i32, %c0_i32_0 : i32, i32
  }
  func.func @transform_5(%arg0: i32) -> (i32, i32) {
    %c0_i32 = arith.constant 0 : i32
    %c0_i32_0 = arith.constant 0 : i32
    %c0_i32_1 = arith.constant 0 : i32
    return %c0_i32, %c0_i32_0 : i32, i32
  }
  func.func @transform_6(%arg0: i32) -> i32 {
    %c0_i32 = arith.constant 0 : i32
    %c0_i32_0 = arith.constant 0 : i32
    return %c0_i32 : i32
  }
  func.func @transform_7(%arg0: i32) -> (i32, i32) {
    %c0_i32 = arith.constant 0 : i32
    %c0_i32_0 = arith.constant 0 : i32
    return %c0_i32, %arg0 : i32, i32
  }
}

</mosaic_0001>

<bundles_post_ra>
// kernel: tpu_custom_call.1
= control target key start
LH: loop header
LB: loop body
LE: loop exit
PB: predicated region body
PF: predicated region fallthrough
CT: control target
= control target key end

     0   :  { %s1851_s0 = inlined_call_operand.vmem [shape: f32[256,64], index: 0, kind: input, shape index: {}]   ;;  %s1852_s1 = inlined_call_operand.vmem [shape: f32[64,128], index: 1, kind: input, shape index: {}]   ;;  %s1853_s2 = inlined_call_operand.vmem [shape: f32[1,128], index: 2, kind: input, shape index: {}]   ;;  %s1854_s3 = inlined_call_operand.vmem [shape: f32[128,128], index: 3, kind: input, shape index: {}]   ;;  %s1855_s4 = inlined_call_operand.vmem [shape: f32[1,128], index: 4, kind: input, shape index: {}]   ;;  %s1856_s5 = inlined_call_operand.vmem [shape: f32[1,128], index: 5, kind: input, shape index: {}]   ;;  %s1857_s6 = inlined_call_operand.<no memory space> [shape: f32[1], index: 6, kind: input, shape index: {}]   ;;  %s1858_s7 = inlined_call_operand.hbm [shape: f32[1,256], index: 7, kind: output, shape index: {}]  }
   0x1   :  { %12 = sst [smem:[#allocation2]] %s1857_s6 }
   0x2   :  { %13 = vsyncpa [#allocation4], 0 }
   0x3   :  { %15 = vsyncpa [#allocation4 + $0x1], 0  ;;  %s1541_s26 = smov 0   ;;  %s1543_s27 = smov 0  }
   0x4   :  { %s1545_s28 = smov 0   ;;  %s1547_s29 = smov 0  }
   0x5 LB: > { %s1069_s6 = sadd.s32 4294967295, %s1495_s29   ;;  %s1070_s30 = sadd.s32 4294967294, %s1495_s29   ;;  %s1495_s29 = sphi %s1547_s29, %s1864_s29   ;;  %s1491_s28 = sphi %s1545_s28, %s1863_s28   ;;  %s1487_s27 = sphi %s1543_s27, %s1862_s27   ;;  %s1483_s26 = sphi %s1541_s26, %s1861_s26  }
   0x6   : > { %s1564_s8 = sadd.s32 1, %s1495_s29   ;;  %s180_s9 = sadd.s32 1, %s1491_s28 }
   0x7   : > { %s177_s10 = ssub.s32 %s1495_s29, %s1564_s8  ;;  %p190_p0 = scmp.ne.s32.totalorder %s1491_s28, %s1487_s27 }
   0x8   : > { %p178_p1 = scmp.eq.s32.totalorder %s177_s10, 0  ;;  %p191_p2 = scmp.eq.s32.totalorder %s1069_s6, 1 }
   0x9   : > { %p196_p3 = scmp.ne.s32.totalorder %s1487_s27, %s1483_s26  ;;  %p197_p4 = scmp.eq.s32.totalorder %s1070_s30, 1 }
   0xa   : > { %s1574_s11 = scalar_select %p178_p1, %s1491_s28, %s180_s9  }
   0xb   : > { %p1576_p5 = por %p191_p2, %p190_p0  ;;  %p1580_p6 = por %p197_p4, %p196_p3 }
   0xc   : > { %p1073_p7 = scmp.ge.s32.totalorder %s1495_s29, 1  ;;  %p242_p8 = scmp.lt.s32.totalorder %s1495_s29, 3 }
   0xe   : > { %p243_p9 = pnand %p1073_p7, %p242_p8 }
   0xf   : > { %v295_v0 = vld [vmem:[%s1852_s1] sm:$0xff] (!%p243_p9)  ;;  %v296_v1 = vld [vmem:[%s1852_s1 + $0x8] sm:$0xff] (!%p243_p9)  ;;  %v297_v2 = vld [vmem:[%s1852_s1 + $0x10] sm:$0xff] (!%p243_p9)  ;;  %s1595_s20 = sshll.u32 (!%p243_p9), %s1069_s6, 4  ;;  %vm310_vm0 = vcmask (!%p243_p9), 523264   ;;  %vm900_vm1 = vcmask (!%p243_p9), 130112  }
  0x10   : > { %246 = sbr.rel (%p243_p9) target bundleno = 691 (0x2b3), region = 48  ;;  %v1266_v3 = vpack.c.bf16 (!%p243_p9), %v296_v1, %v295_v0  ;;  %v298_v4 = vld [vmem:[%s1852_s1 + $0x18] sm:$0xff] (!%p243_p9)  ;;  %p274_p10 = scmp.lt.s32.totalorder (!%p243_p9), %s1595_s20, 31  ;;  %v299_v6 = vld [vmem:[%s1852_s1 + $0x20] sm:$0xff] (!%p243_p9)  ;;  %v300_v7 = vld [vmem:[%s1852_s1 + $0x28] sm:$0xff] (!%p243_p9)  ;;  %vm907_vm2 = vcmask (!%p243_p9), 195712  }
  0x11   : > { %v1270_v5 = vpack.c.bf16 (!%p243_p9), %v298_v4, %v297_v2  ;;  %v520_v8 = vld [vmem:[%s1854_s3] sm:$0xff] (!%p243_p9)  ;;  %v521_v9 = vld [vmem:[%s1854_s3 + $0x8] sm:$0xff] (!%p243_p9)  ;;  %v522_v11 = vld [vmem:[%s1854_s3 + $0x10] sm:$0xff] (!%p243_p9)  ;;  %v1274_v13 = vpack.c.bf16 (!%p243_p9), %v300_v7, %v299_v6  ;;  %vm914_vm3 = vcmask (!%p243_p9), 261312   ;;  %vm921_vm4 = vcmask (!%p243_p9), 326912   ;;  %s271_s15 = sand.u32 (!%p243_p9), 1, %s1487_s27  }
  0x12   : > { %1267 = vmatprep.subr.bf16.mxu0 (!%p243_p9), %v1266_v3  ;;  %v1282_v10 = vpack.c.bf16 (!%p243_p9), %v521_v9, %v520_v8  ;;  %v523_v12 = vld [vmem:[%s1854_s3 + $0x18] sm:$0xff] (!%p243_p9)  ;;  %v301_v14 = vld [vmem:[%s1852_s1 + $0x30] sm:$0xff] (!%p243_p9)  ;;  %v524_v18 = vld [vmem:[%s1854_s3 + $0x20] sm:$0xff] (!%p243_p9)  ;;  %vm928_vm5 = vcmask (!%p243_p9), 392512   ;;  %vm935_vm6 = vcmask (!%p243_p9), 458112   ;;  %vm942_vm7 = vcmask (!%p243_p9), 523712  }
  0x13   : > { %1269 = vmatpush3.bf16.msra.mxu0 (!%p243_p9), %v1266_v3  ;;  %v302_v15 = vld [vmem:[%s1852_s1 + $0x38] sm:$0xff] (!%p243_p9)  ;;  %v1286_v17 = vpack.c.bf16 (!%p243_p9), %v523_v12, %v522_v11  ;;  %v525_v19 = vld [vmem:[%s1854_s3 + $0x28] sm:$0xff] (!%p243_p9)  ;;  %v526_v22 = vld [vmem:[%s1854_s3 + $0x30] sm:$0xff] (!%p243_p9)  ;;  %vm949_vm8 = vcmask (!%p243_p9), 589312   ;;  %vm956_vm9 = vcmask (!%p243_p9), 654912   ;;  %vm963_vm10 = vcmask (!%p243_p9), 720512  }
  0x14   : > { %1271 = vmatprep.subr.bf16.mxu0 (!%p243_p9), %v1270_v5  ;;  %1314 = vmatprep.subr.bf16.mxu1 (!%p243_p9), %v1282_v10  ;;  %v1278_v20 = vpack.c.bf16 (!%p243_p9), %v302_v15, %v301_v14  ;;  %v1290_v21 = vpack.c.bf16 (!%p243_p9), %v525_v19, %v524_v18  ;;  %v527_v23 = vld [vmem:[%s1854_s3 + $0x38] sm:$0xff] (!%p243_p9)  ;;  %v528_v26 = vld [vmem:[%s1854_s3 + $0x40] sm:$0xff] (!%p243_p9)  ;;  %v529_v27 = vld [vmem:[%s1854_s3 + $0x48] sm:$0xff] (!%p243_p9)  ;;  %vm970_vm11 = vcmask (!%p243_p9), 786112   ;;  %vm977_vm12 = vcmask (!%p243_p9), 851712   ;;  %s272_s16 = scalar_lea.vmem (!%p243_p9), [#allocation3], %s271_s15 }
  0x15   : > { %1322 = vmatpush3.bf16.msra.mxu1 (!%p243_p9), %v1282_v10  ;;  %v1294_v24 = vpack.c.bf16 (!%p243_p9), %v527_v23, %v526_v22  ;;  %v1298_v29 = vpack.c.bf16 (!%p243_p9), %v529_v27, %v528_v26  ;;  %v530_v31 = vld [vmem:[%s1854_s3 + $0x50] sm:$0xff] (!%p243_p9)  ;;  %v531_v32 = vld [vmem:[%s1854_s3 + $0x58] sm:$0xff] (!%p243_p9)  ;;  %v532_v36 = vld [vmem:[%s1854_s3 + $0x60] sm:$0xff] (!%p243_p9)  ;;  %vm984_vm13 = vcmask (!%p243_p9), 917312   ;;  %vm991_vm14 = vcmask (!%p243_p9), 982912   ;;  %s1015_s17 = sshll.u32 (!%p243_p9), %s272_s16, 4  ;;  %s1811_s17 = int_to_ptr.vmem [resolvable:$true] %s1015_s17 }
  0x16   : > { %1315 = vmatprep.subr.bf16.mxu1 (!%p243_p9), %v1286_v17  ;;  %v1302_v34 = vpack.c.bf16 (!%p243_p9), %v531_v32, %v530_v31  ;;  %v533_v37 = vld [vmem:[%s1854_s3 + $0x68] sm:$0xff] (!%p243_p9)  ;;  %v534_v49 = vld [vmem:[%s1854_s3 + $0x70] sm:$0xff] (!%p243_p9)  ;;  %v535_v50 = vld [vmem:[%s1854_s3 + $0x78] sm:$0xff] (!%p243_p9)  ;;  %vm998_vm15 = vcmask (!%p243_p9), 1048512   ;;  %s1003_s22 = scalar_lea.sflag (!%p243_p9), [#allocation4], %s271_s15  ;;  %s1433_s23 = scalar_lea.vmem (!%p243_p9), %s1811_s17, 16 }
  0x17   : > { %s275_s10 = scalar_select %p274_p10, %s1595_s20, 31  ;;  %1273 = vmatpush3.bf16.msra.mxu0 %v1270_v5  ;;  %v1306_v39 = vpack.c.bf16 %v533_v37, %v532_v36  ;;  %v1310_v51 = vpack.c.bf16 %v535_v50, %v534_v49  ;;  %v1076_v52 = vld [vmem:[%s1853_s2] ss:$0 sm:$0xff] }
  0x18   : > { %1275 = vmatprep.subr.bf16.mxu0 %v1274_v13  ;;  %v1705_v37 = vld [vmem:[%s1855_s4] ss:$0 sm:$0xff]  ;;  %p1434_p11 = scmp.ne.s32.totalorder %s1811_s17, %s1433_s23  ;;  %s1497_s24 = smov [#allocation3]  }
  0x19   : > { %s1075_s21 = sshll.u32 %s275_s10, 3  ;;  %1323 = vmatpush3.bf16.msra.mxu1 %v1286_v17  ;;  %s759_s10 = sld [smem:[#allocation2]] }
  0x1a   : > { %s1629_s6 = scalar_lea.vmem %s1851_s0, %s1075_s21  ;;  %1316 = vmatprep.subr.bf16.mxu1 %v1290_v21  ;;  %s1809_s21 = scalar_lea.hbm %s1858_s7, %s1595_s20 }
  0x1b   : > { %v279_v16 = vld [vmem:[%s1629_s6] sm:$0xff]  ;;  %1277 = vmatpush3.bf16.msra.mxu0 %v1274_v13  ;;  %v280_v25 = vld [vmem:[%s1629_s6 + $0x8] sm:$0xff]  ;;  %v281_v28 = vld [vmem:[%s1629_s6 + $0x10] sm:$0xff]  ;;  %p1435_p12 = pnand %p1434_p11, %p1576_p5  ;;  %s1437_s25 = sshll.u32 %s1497_s24, 4  ;;  %s1438_s25 = int_to_ptr.vmem [resolvable:$false] %s1437_s25 }
  0x1c   : > { %1186 = vmatprep.mubr.msk.f32.mxu0 %vm310_vm0, %v279_v16  ;;  %1279 = vmatprep.subr.bf16.mxu0 %v1278_v20  ;;  %v282_v30 = vld [vmem:[%s1629_s6 + $0x18] sm:$0xff]  ;;  %v283_v33 = vld [vmem:[%s1629_s6 + $0x20] sm:$0xff]  ;;  %v284_v35 = vld [vmem:[%s1629_s6 + $0x28] sm:$0xff]  ;;  %p1440_p0 = scmp.lt.s32.totalorder %s1811_s17, %s1438_s25 }
  0x1d   : > { %1324 = vmatpush3.bf16.msra.mxu1 %v1290_v21  ;;  %v285_v38 = vld [vmem:[%s1629_s6 + $0x30] sm:$0xff]  ;;  %v286_v40 = vld [vmem:[%s1629_s6 + $0x38] sm:$0xff]  ;;  %v287_v41 = vld [vmem:[%s1629_s6 + $0x40] sm:$0xff]  ;;  %p1436_p13 = pneg %p1435_p12 }
  0x1e   : > { %1317 = vmatprep.subr.bf16.mxu1 %v1294_v24  ;;  %v288_v42 = vld [vmem:[%s1629_s6 + $0x48] sm:$0xff]  ;;  %v289_v43 = vld [vmem:[%s1629_s6 + $0x50] sm:$0xff]  ;;  %v290_v44 = vld [vmem:[%s1629_s6 + $0x58] sm:$0xff] }
  0x1f   : > { %1281 = vmatpush3.bf16.msra.mxu0 %v1278_v20  ;;  %v291_v45 = vld [vmem:[%s1629_s6 + $0x60] sm:$0xff]  ;;  %v292_v46 = vld [vmem:[%s1629_s6 + $0x68] sm:$0xff]  ;;  %v293_v47 = vld [vmem:[%s1629_s6 + $0x70] sm:$0xff] }
  0x20   : > { %1283 = vmatprep.subr.bf16.mxu0 %v1282_v10  ;;  %v294_v48 = vld [vmem:[%s1629_s6 + $0x78] sm:$0xff]  ;;  %s1439_s6 = scalar_lea.vmem %s1438_s25, 32 }
  0x21   : > { %1325 = vmatpush3.bf16.msra.mxu1 %v1294_v24  ;;  %p1441_p1 = scmp.lt.s32.totalorder %s1439_s6, %s1433_s23 }
  0x22   : > { %1187 = vmatmul.mubr.msk.f32.vlgmr.msra.gmra.mrb[0].mxu0 %vm310_vm0, %v280_v25  ;;  %1318 = vmatprep.subr.bf16.mxu1 %v1298_v29 }
  0x23   : > { %1189 = vmatprep.mubr.msk.f32.mxu0 %vm310_vm0, %v281_v28  ;;  %1285 = vmatpush3.bf16.msra.mxu0 %v1282_v10  ;;  %p1442_p2 = por %p1441_p1, %p1440_p0 }
  0x24   : > { %1287 = vmatprep.subr.bf16.mxu0 %v1286_v17 }
  0x25   : > { %1326 = vmatpush3.bf16.msra.mxu1 %v1298_v29  ;;  %p1443_p3 = pnand %p1442_p2, %p1436_p13 }
  0x26   : > { %1190 = vmatmul.mubr.msk.f32.gmra.mrb[2].mxu0 %vm310_vm0, %v282_v30  ;;  %1319 = vmatprep.subr.bf16.mxu1 %v1302_v34 }
  0x27   : > { %1192 = vmatprep.mubr.msk.f32.mxu0 %vm310_vm0, %v283_v33  ;;  %1289 = vmatpush3.bf16.msra.mxu0 %v1286_v17 }
  0x28   : > { %1291 = vmatprep.subr.bf16.mxu0 %v1290_v21 }
  0x29   : > { %1327 = vmatpush3.bf16.msra.mxu1 %v1302_v34 }
  0x2a   : > { %1193 = vmatmul.mubr.msk.f32.gmra.mrb[4].mxu0 %vm310_vm0, %v284_v35  ;;  %1320 = vmatprep.subr.bf16.mxu1 %v1306_v39 }
  0x2b   : > { %1195 = vmatprep.mubr.msk.f32.mxu0 %vm310_vm0, %v285_v38  ;;  %1293 = vmatpush3.bf16.msra.mxu0 %v1290_v21 }
  0x2c   : > { %1295 = vmatprep.subr.bf16.mxu0 %v1294_v24 }
  0x2d   : > { %1328 = vmatpush3.bf16.msra.mxu1 %v1306_v39 }
  0x2e   : > { %1196 = vmatmul.mubr.msk.f32.gmra.mrb[6].mxu0 %vm310_vm0, %v286_v40  ;;  %1321 = vmatprep.subr.bf16.mxu1 %v1310_v51 }
  0x2f   : > { %1198 = vmatprep.mubr.msk.f32.mxu0 %vm310_vm0, %v287_v41  ;;  %1297 = vmatpush3.bf16.msra.mxu0 %v1294_v24 }
  0x30   : > { %1299 = vmatprep.subr.bf16.mxu0 %v1298_v29 }
  0x31   : > { %1329 = vmatpush3.bf16.msra.mxu1 %v1310_v51 }
  0x32   : > { %1199 = vmatmul.mubr.msk.f32.gmra.mrb[8].mxu0 %vm310_vm0, %v288_v42  ;;  %v1712_v42 = vld [vmem:[%s1856_s5] ss:$0 sm:$0xff] }
  0x33   : > { %1201 = vmatprep.mubr.msk.f32.mxu0 %vm310_vm0, %v289_v43  ;;  %1301 = vmatpush3.bf16.msra.mxu0 %v1298_v29 }
  0x34   : > { %1303 = vmatprep.subr.bf16.mxu0 %v1302_v34 }
  0x36   : > { %1202 = vmatmul.mubr.msk.f32.gmra.mrb[10].mxu0 %vm310_vm0, %v290_v44 }
  0x37   : > { %1204 = vmatprep.mubr.msk.f32.mxu0 %vm310_vm0, %v291_v45  ;;  %1305 = vmatpush3.bf16.msra.mxu0 %v1302_v34 }
  0x38   : > { %1307 = vmatprep.subr.bf16.mxu0 %v1306_v39 }
  0x3a   : > { %1205 = vmatmul.mubr.msk.f32.gmra.mrb[12].mxu0 %vm310_vm0, %v292_v46 }
  0x3b   : > { %1207 = vmatprep.mubr.msk.f32.mxu0 %vm310_vm0, %v293_v47  ;;  %1309 = vmatpush3.bf16.msra.mxu0 %v1306_v39 }
  0x3c   : > { %1311 = vmatprep.subr.bf16.mxu0 %v1310_v51 }
  0x3e   : > { %1208 = vmatmul.mubr.msk.f32.gmra.mrb[14].mxu0 %vm310_vm0, %v294_v48 }
  0x3f   : > { %1313 = vmatpush3.bf16.msra.mxu0 %v1310_v51 }
  0xf5   : > { %v1188_v53 = vpop.f32.mrb[0].mxu0 }
  0xf6   : > { %v431_v54 = vadd.f32 %v1188_v53, %v1076_v52  ;;  %v425_v55 = vpop.f32.mrb[1].mxu0 }
  0xf7   : > { %v426_v56 = vadd.f32 %v1076_v52, %v425_v55 }
  0xf8   : > { %v505_v59 = vmax.f32 %v431_v54, 0.0 }
  0xf9   : > { %v504_v57 = vmax.f32 %v426_v56, 0.0  ;;  %v1191_v58 = vpop.f32.mrb[2].mxu0 }
  0xfa   : > { %v441_v60 = vadd.f32 %v1191_v58, %v1076_v52  ;;  %v435_v61 = vpop.f32.mrb[3].mxu0 }
  0xfb   : > { %v436_v62 = vadd.f32 %v1076_v52, %v435_v61  ;;  %1242 = vmatprep.mubr.f32.mxu0 %v504_v57 }
  0xfc   : > { %1243 = vmatmul.mubr.f32.vlgmr.msra.gmra.mrb[16].mxu0 %v505_v59  ;;  %v507_v1 = vmax.f32 %v441_v60, 0.0 }
  0xfd   : > { %v506_v63 = vmax.f32 %v436_v62, 0.0  ;;  %v1194_v0 = vpop.f32.mrb[4].mxu0 }
  0xfe   : > { %v451_v2 = vadd.f32 %v1194_v0, %v1076_v52  ;;  %v445_v3 = vpop.f32.mrb[5].mxu0 }
  0xff   : > { %1245 = vmatprep.mubr.f32.mxu0 %v506_v63  ;;  %v446_v4 = vadd.f32 %v1076_v52, %v445_v3 }
 0x100   : > { %v509_v5 = vmax.f32 %v451_v2, 0.0  ;;  %1246 = vmatmul.mubr.f32.gmra.mrb[18].mxu0 %v507_v1 }
 0x101   : > { %v1197_v6 = vpop.f32.mrb[6].mxu0  ;;  %v508_v7 = vmax.f32 %v446_v4, 0.0 }
 0x102   : > { %v461_v8 = vadd.f32 %v1197_v6, %v1076_v52  ;;  %v455_v9 = vpop.f32.mrb[7].mxu0 }
 0x103   : > { %v456_v10 = vadd.f32 %v1076_v52, %v455_v9  ;;  %1248 = vmatprep.mubr.f32.mxu1 %v508_v7 }
 0x104   : > { %v511_v11 = vmax.f32 %v461_v8, 0.0  ;;  %1249 = vmatmul.mubr.f32.vlgmr.msra.gmra.mrb[0].mxu1 %v509_v5 }
 0x105   : > { %v510_v12 = vmax.f32 %v456_v10, 0.0  ;;  %v1200_v13 = vpop.f32.mrb[8].mxu0 }
 0x106   : > { %v471_v14 = vadd.f32 %v1200_v13, %v1076_v52  ;;  %v465_v15 = vpop.f32.mrb[9].mxu0 }
 0x107   : > { %v466_v16 = vadd.f32 %v1076_v52, %v465_v15  ;;  %1251 = vmatprep.mubr.f32.mxu1 %v510_v12 }
 0x108   : > { %v513_v17 = vmax.f32 %v471_v14, 0.0  ;;  %1252 = vmatmul.mubr.f32.gmra.mrb[2].mxu1 %v511_v11 }
 0x109   : > { %v512_v18 = vmax.f32 %v466_v16, 0.0  ;;  %v1203_v19 = vpop.f32.mrb[10].mxu0 }
 0x10a   : > { %v481_v20 = vadd.f32 %v1203_v19, %v1076_v52  ;;  %v475_v21 = vpop.f32.mrb[11].mxu0 }
 0x10b   : > { %v476_v22 = vadd.f32 %v1076_v52, %v475_v21  ;;  %1254 = vmatprep.mubr.f32.mxu1 %v512_v18 }
 0x10c   : > { %v515_v23 = vmax.f32 %v481_v20, 0.0  ;;  %1255 = vmatmul.mubr.f32.gmra.mrb[4].mxu1 %v513_v17 }
 0x10d   : > { %v514_v24 = vmax.f32 %v476_v22, 0.0  ;;  %v1206_v25 = vpop.f32.mrb[12].mxu0 }
 0x10e   : > { %v491_v26 = vadd.f32 %v1206_v25, %v1076_v52  ;;  %v485_v27 = vpop.f32.mrb[13].mxu0 }
 0x10f   : > { %v486_v28 = vadd.f32 %v1076_v52, %v485_v27  ;;  %1257 = vmatprep.mubr.f32.mxu1 %v514_v24 }
 0x110   : > { %v517_v29 = vmax.f32 %v491_v26, 0.0  ;;  %1258 = vmatmul.mubr.f32.gmra.mrb[6].mxu1 %v515_v23 }
 0x111   : > { %v516_v30 = vmax.f32 %v486_v28, 0.0  ;;  %v1209_v31 = vpop.f32.mrb[14].mxu0 }
 0x112   : > { %v501_v32 = vadd.f32 %v1209_v31, %v1076_v52  ;;  %v495_v33 = vpop.f32.mrb[15].mxu0 }
 0x113   : > { %v496_v34 = vadd.f32 %v1076_v52, %v495_v33  ;;  %1260 = vmatprep.mubr.f32.mxu1 %v516_v30 }
 0x114   : > { %v519_v35 = vmax.f32 %v501_v32, 0.0  ;;  %1261 = vmatmul.mubr.f32.gmra.mrb[8].mxu1 %v517_v29 }
 0x115   : > { %v518_v36 = vmax.f32 %v496_v34, 0.0 }
 0x117   : > { %1263 = vmatprep.mubr.f32.mxu1 %v518_v36 }
 0x118   : > { %1264 = vmatmul.mubr.f32.gmra.mrb[10].mxu1 %v519_v35 }
 0x1cf   : > { %v1244_v38 = vpop.f32.mrb[16].mxu0 }
 0x1d0   : > { %v615_v39 = vadd.f32 %v1244_v38, %v1705_v37  ;;  %v609_v40 = vpop.f32.mrb[17].mxu0 }
 0x1d1   : > { %v610_v41 = vadd.f32 %v1705_v37, %v609_v40  ;;  %v1744_v40 = vstv %s759_s10 }
 0x1d2   : > { %v689_v43 = vmax.f32 %v615_v39, 0.0 }
 0x1d3   : > { %v1247_v44 = vpop.f32.mrb[18].mxu0  ;;  %v688_v45 = vmax.f32 %v610_v41, 0.0 }
 0x1d4   : > { %v625_v46 = vadd.f32 %v1247_v44, %v1705_v37  ;;  %v619_v47 = vpop.f32.mrb[19].mxu0  ;;  %v712_v48 = vmul.f32 %v1712_v42, %v689_v43 }
 0x1d5   : > { %v620_v49 = vadd.f32 %v1705_v37, %v619_v47  ;;  %v711_v56 = vmul.f32 %v1712_v42, %v688_v45 }
 0x1d6   : > { %v691_v50 = vmax.f32 %v625_v46, 0.0  ;;  %729 = vadd.xlane.f32.xlu0 %v712_v48 }
 0x1d7   : > { %v1250_v51 = vpop.f32.mrb[0].mxu1  ;;  %v690_v52 = vmax.f32 %v620_v49, 0.0 }
 0x1d8   : > { %v635_v53 = vadd.f32 %v1250_v51, %v1705_v37  ;;  %v629_v54 = vpop.f32.mrb[1].mxu1  ;;  %v714_v55 = vmul.f32 %v1712_v42, %v691_v50 }
 0x1d9   : > { %v630_v57 = vadd.f32 %v1705_v37, %v629_v54  ;;  %v713_v63 = vmul.f32 %v1712_v42, %v690_v52 }
 0x1da   : > { %733 = vadd.xlane.f32.xlu1 %v714_v55  ;;  %727 = vadd.xlane.f32.xlu0 %v711_v56  ;;  %v693_v60 = vmax.f32 %v635_v53, 0.0 }
 0x1db   : > { %v692_v58 = vmax.f32 %v630_v57, 0.0  ;;  %v1253_v59 = vpop.f32.mrb[2].mxu1 }
 0x1dc   : > { %v645_v61 = vadd.f32 %v1253_v59, %v1705_v37  ;;  %v639_v62 = vpop.f32.mrb[3].mxu1  ;;  %v716_v7 = vmul.f32 %v1712_v42, %v693_v60 }
 0x1dd   : > { %v640_v0 = vadd.f32 %v1705_v37, %v639_v62  ;;  %v715_v1 = vmul.f32 %v1712_v42, %v692_v58 }
 0x1de   : > { %731 = vadd.xlane.f32.xlu1 %v713_v63  ;;  %v695_v4 = vmax.f32 %v645_v61, 0.0 }
 0x1df   : > { %v694_v2 = vmax.f32 %v640_v0, 0.0  ;;  %v1256_v3 = vpop.f32.mrb[4].mxu1  ;;  %735 = vadd.xlane.f32.xlu0 %v715_v1 }
 0x1e0   : > { %v655_v5 = vadd.f32 %v1256_v3, %v1705_v37  ;;  %v649_v6 = vpop.f32.mrb[5].mxu1  ;;  %v718_v15 = vmul.f32 %v1712_v42, %v695_v4  ;;  %v889_v4 = vlaneseq }
 0x1e1   : > { %v650_v8 = vadd.f32 %v1705_v37, %v649_v6  ;;  %v717_v9 = vmul.f32 %v1712_v42, %v694_v2 }
 0x1e2   : > { %737 = vadd.xlane.f32.xlu1 %v716_v7  ;;  %v697_v12 = vmax.f32 %v655_v5, 0.0 }
 0x1e3   : > { %v696_v10 = vmax.f32 %v650_v8, 0.0  ;;  %v1259_v11 = vpop.f32.mrb[6].mxu1  ;;  %739 = vadd.xlane.f32.xlu0 %v717_v9 }
 0x1e4   : > { %v665_v13 = vadd.f32 %v1259_v11, %v1705_v37  ;;  %v659_v14 = vpop.f32.mrb[7].mxu1  ;;  %v720_v23 = vmul.f32 %v1712_v42, %v697_v12 }
 0x1e5   : > { %v660_v16 = vadd.f32 %v1705_v37, %v659_v14  ;;  %v719_v17 = vmul.f32 %v1712_v42, %v696_v10 }
 0x1e6   : > { %741 = vadd.xlane.f32.xlu1 %v718_v15  ;;  %v699_v20 = vmax.f32 %v665_v13, 0.0  ;;  %v1757_v15 = vand.u32 127, %v889_v4 }
 0x1e7   : > { %v698_v18 = vmax.f32 %v660_v16, 0.0  ;;  %v1262_v19 = vpop.f32.mrb[8].mxu1  ;;  %743 = vadd.xlane.f32.xlu0 %v719_v17 }
 0x1e8   : > { %v675_v21 = vadd.f32 %v1262_v19, %v1705_v37  ;;  %v669_v22 = vpop.f32.mrb[9].mxu1  ;;  %v722_v31 = vmul.f32 %v1712_v42, %v699_v20 }
 0x1e9   : > { %v670_v24 = vadd.f32 %v1705_v37, %v669_v22  ;;  %v721_v25 = vmul.f32 %v1712_v42, %v698_v18 }
 0x1ea   : > { %745 = vadd.xlane.f32.xlu1 %v720_v23  ;;  %v701_v28 = vmax.f32 %v675_v21, 0.0 }
 0x1eb   : > { %v700_v26 = vmax.f32 %v670_v24, 0.0  ;;  %v1265_v27 = vpop.f32.mrb[10].mxu1  ;;  %747 = vadd.xlane.f32.xlu0 %v721_v25  ;;  %v1760_v24 = vshrl.u32 %v889_v4, 7 }
 0x1ec   : > { %v685_v29 = vadd.f32 %v1265_v27, %v1705_v37  ;;  %v679_v30 = vpop.f32.mrb[11].mxu1  ;;  %v724_v36 = vmul.f32 %v1712_v42, %v701_v28  ;;  %v895_v27 = vadd.s32 4294967288, %v1757_v15  ;;  %v909_v28 = vadd.s32 4294967272, %v1757_v15 }
 0x1ed   : > { %v680_v32 = vadd.f32 %v1705_v37, %v679_v30  ;;  %v723_v33 = vmul.f32 %v1712_v42, %v700_v26 }
 0x1ee   : > { %749 = vadd.xlane.f32.xlu1 %v722_v31  ;;  %v703_v35 = vmax.f32 %v685_v29, 0.0 }
 0x1ef   : > { %v702_v34 = vmax.f32 %v680_v32, 0.0  ;;  %751 = vadd.xlane.f32.xlu0 %v723_v33 }
 0x1f0   : > { %v726_v39 = vmul.f32 %v1712_v42, %v703_v35  ;;  %v902_v35 = vadd.s32 4294967280, %v1757_v15 }
 0x1f1   : > { %v725_v38 = vmul.f32 %v1712_v42, %v702_v34  ;;  %v893_v34 = vsub.s32 %v1757_v15, %v1760_v24 }
 0x1f2   : > { %753 = vadd.xlane.f32.xlu1 %v724_v36 }
 0x1f3   : > { %755 = vadd.xlane.f32.xlu0 %v725_v38 }
 0x1f6   : > { %757 = vadd.xlane.f32.xlu1 %v726_v39 }
 0x263   : > { %v730_v41 = vpop.xlane.xlu0 %729 }
 0x264   : > { %v762_v37 = vadd.f32 %v1744_v40, %v730_v41  ;;  %v916_v41 = vadd.s32 4294967264, %v1757_v15 }
 0x266   : > { %v1096_v43 = vmul.f32 -1.442695, %v762_v37 }
 0x267   : > { %v734_v44 = vpop.xlane.xlu1 %733  ;;  %v728_v45 = vpop.xlane.xlu0 %727 }
 0x268   : > { %1369 = vpow2.f32 %v1096_v43  ;;  %v764_v46 = vadd.f32 %v1744_v40, %v734_v44  ;;  %v761_v47 = vadd.f32 %v1744_v40, %v728_v45  ;;  %v898_v45 = vsub.s32 %v895_v27, %v1760_v24 }
 0x26a   : > { %v1098_v48 = vmul.f32 -1.442695, %v764_v46  ;;  %v1095_v49 = vmul.f32 -1.442695, %v761_v47  ;;  %v912_v46 = vsub.s32 %v909_v28, %v1760_v24 }
 0x26b   : > { %v732_v50 = vpop.xlane.xlu1 %731 }
 0x26c   : > { %1371 = vpow2.f32 %v1098_v48  ;;  %v763_v42 = vadd.f32 %v1744_v40, %v732_v50  ;;  %v736_v51 = vpop.xlane.xlu0 %735 }
 0x26d   : > { %1373 = vpow2.f32 %v1095_v49  ;;  %v765_v52 = vadd.f32 %v1744_v40, %v736_v51 }
 0x26e   : > { %v1097_v53 = vmul.f32 -1.442695, %v763_v42 }
 0x26f   : > { %v1099_v54 = vmul.f32 -1.442695, %v765_v52  ;;  %v738_v55 = vpop.xlane.xlu1 %737  ;;  %v905_v52 = vsub.s32 %v902_v35, %v1760_v24  ;;  %v965_v35 = vadd.s32 4294967208, %v1757_v15 }
 0x270   : > { %1375 = vpow2.f32 %v1097_v53  ;;  %v766_v56 = vadd.f32 %v1744_v40, %v738_v55  ;;  %v740_v57 = vpop.xlane.xlu0 %739  ;;  %v923_v53 = vadd.s32 4294967256, %v1757_v15 }
 0x271   : > { %1377 = vpow2.f32 %v1099_v54  ;;  %v767_v58 = vadd.f32 %v1744_v40, %v740_v57  ;;  %v919_v57 = vsub.s32 %v916_v41, %v1760_v24 }
 0x272   : > { %v1370_v59 = vpop.eup %1369  ;;  %v1100_v60 = vmul.f32 -1.442695, %v766_v56 }
 0x273   : > { %v826_v61 = vadd.f32 1.0, %v1370_v59  ;;  %v1101_v62 = vmul.f32 -1.442695, %v767_v58  ;;  %v742_v63 = vpop.xlane.xlu1 %741 }
 0x274   : > { %1379 = vpow2.f32 %v1100_v60  ;;  %v768_v0 = vadd.f32 %v1744_v40, %v742_v63  ;;  %v744_v1 = vpop.xlane.xlu0 %743  ;;  %v930_v63 = vadd.s32 4294967248, %v1757_v15 }
 0x275   : > { %v769_v2 = vadd.f32 %v1744_v40, %v744_v1  ;;  %1381 = vpow2.f32 %v1101_v62 }
 0x276   : > { %v1372_v3 = vpop.eup %1371  ;;  %v1102_v5 = vmul.f32 -1.442695, %v768_v0  ;;  %1383 = vrcp.f32 %v826_v61 }
 0x277   : > { %v1374_v6 = vpop.eup %1373  ;;  %v828_v7 = vadd.f32 1.0, %v1372_v3  ;;  %v1103_v8 = vmul.f32 -1.442695, %v769_v2  ;;  %v746_v9 = vpop.xlane.xlu1 %745  ;;  %v937_v3 = vadd.s32 4294967240, %v1757_v15 }
 0x278   : > { %v825_v10 = vadd.f32 1.0, %v1374_v6  ;;  %1385 = vpow2.f32 %v1102_v5  ;;  %v770_v11 = vadd.f32 %v1744_v40, %v746_v9  ;;  %v748_v12 = vpop.xlane.xlu0 %747 }
 0x279   : > { %1387 = vrcp.f32 %v828_v7  ;;  %v771_v13 = vadd.f32 %v1744_v40, %v748_v12 }
 0x27a   : > { %v1376_v14 = vpop.eup %1375  ;;  %1389 = vrcp.f32 %v825_v10  ;;  %v1104_v16 = vmul.f32 -1.442695, %v770_v11  ;;  %v944_v10 = vadd.s32 4294967232, %v1757_v15 }
 0x27b   : > { %v1378_v17 = vpop.eup %1377  ;;  %v827_v18 = vadd.f32 1.0, %v1376_v14  ;;  %1391 = vpow2.f32 %v1103_v8  ;;  %v1105_v19 = vmul.f32 -1.442695, %v771_v13  ;;  %v750_v20 = vpop.xlane.xlu1 %749  ;;  %v933_v14 = vsub.s32 %v930_v63, %v1760_v24 }
 0x27c   : > { %v829_v21 = vadd.f32 1.0, %v1378_v17  ;;  %1393 = vpow2.f32 %v1104_v16  ;;  %v772_v22 = vadd.f32 %v1744_v40, %v750_v20  ;;  %v752_v23 = vpop.xlane.xlu0 %751  ;;  %v951_v20 = vadd.s32 4294967224, %v1757_v15 }
 0x27d   : > { %1395 = vrcp.f32 %v827_v18  ;;  %v773_v25 = vadd.f32 %v1744_v40, %v752_v23 }
 0x27e   : > { %v1380_v26 = vpop.eup %1379  ;;  %1397 = vrcp.f32 %v829_v21  ;;  %v1106_v29 = vmul.f32 -1.442695, %v772_v22 }
 0x27f   : > { %v830_v30 = vadd.f32 1.0, %v1380_v26  ;;  %1399 = vpow2.f32 %v1105_v19  ;;  %v1107_v31 = vmul.f32 -1.442695, %v773_v25  ;;  %v754_v32 = vpop.xlane.xlu1 %753  ;;  %v1382_v33 = vpop.eup %1381  ;;  %v940_v19 = vsub.s32 %v937_v3, %v1760_v24 }
 0x280   : > { %1401 = vpow2.f32 %v1106_v29  ;;  %v774_v36 = vadd.f32 %v1744_v40, %v754_v32  ;;  %v756_v38 = vpop.xlane.xlu0 %755  ;;  %v1384_v39 = vpop.eup %1383  ;;  %v831_v37 = vadd.f32 1.0, %v1382_v33  ;;  %v947_v26 = vsub.s32 %v944_v10, %v1760_v24 }
 0x281   : > { %1403 = vrcp.f32 %v830_v30  ;;  %v775_v43 = vadd.f32 %v1744_v40, %v756_v38  ;;  %v899_v62 = vrot.slane %v1384_v39, %v898_v45  ;;  %v958_v29 = vadd.s32 4294967216, %v1757_v15 }
 0x282   : > { %v1386_v44 = vpop.eup %1385  ;;  %1405 = vpow2.f32 %v1107_v31  ;;  %v1108_v47 = vmul.f32 -1.442695, %v774_v36  ;;  %v972_v39 = vadd.s32 4294967200, %v1757_v15 }
 0x283   : > { %v1388_v48 = vpop.eup %1387  ;;  %1407 = vrcp.f32 %v831_v37  ;;  %v832_v49 = vadd.f32 1.0, %v1386_v44  ;;  %v1109_v50 = vmul.f32 -1.442695, %v775_v43  ;;  %v758_v42 = vpop.xlane.xlu1 %757  ;;  %v961_v44 = vsub.s32 %v958_v29, %v1760_v24 }
 0x284   : > { %v1390_v51 = vpop.eup %1389  ;;  %1409 = vpow2.f32 %v1108_v47  ;;  %v776_v54 = vadd.f32 %v1744_v40, %v758_v42  ;;  %v926_v40 = vsub.s32 %v923_v53, %v1760_v24  ;;  %v913_v5 = vrot.slane %v1388_v48, %v912_v46 }
 0x285   : > { %v1392_v55 = vpop.eup %1391  ;;  %v894_v56 = vrot.slane %v1390_v51, %v893_v34  ;;  %1411 = vrcp.f32 %v832_v49  ;;  %v954_v34 = vsub.s32 %v951_v20, %v1760_v24  ;;  %v968_v48 = vsub.s32 %v965_v35, %v1760_v24 }
 0x286   : > { %v1394_v58 = vpop.eup %1393  ;;  %v833_v59 = vadd.f32 1.0, %v1392_v55  ;;  %1413 = vpow2.f32 %v1109_v50  ;;  %v1110_v60 = vmul.f32 -1.442695, %v776_v54  ;;  %v979_v49 = vadd.s32 4294967192, %v1757_v15 }
 0x287   : > { %v1396_v61 = vpop.eup %1395  ;;  %v834_v0 = vadd.f32 1.0, %v1394_v58  ;;  %v901_v6 = vsel %vm900_vm1, %v899_v62, %v894_v56  ;;  %v975_v51 = vsub.s32 %v972_v39, %v1760_v24  ;;  %v986_v55 = vadd.s32 4294967184, %v1757_v15 }
 0x288   : > { %v1398_v1 = vpop.eup %1397  ;;  %v906_v2 = vrot.slane %v1396_v61, %v905_v52  ;;  %1415 = vrcp.f32 %v833_v59  ;;  %v982_v58 = vsub.s32 %v979_v49, %v1760_v24 }
 0x289   : > { %v1400_v4 = vpop.eup %1399  ;;  %v920_v7 = vrot.slane %v1398_v1, %v919_v57  ;;  %1417 = vrcp.f32 %v834_v0  ;;  %v989_v0 = vsub.s32 %v986_v55, %v1760_v24 }
 0x28a   : > { %v1402_v8 = vpop.eup %1401  ;;  %v908_v9 = vsel %vm907_vm2, %v906_v2, %v901_v6  ;;  %v835_v11 = vadd.f32 1.0, %v1400_v4  ;;  %1419 = vpow2.f32 %v1110_v60  ;;  %v993_v60 = vadd.s32 4294967176, %v1757_v15 }
 0x28b   : > { %v1404_v12 = vpop.eup %1403  ;;  %v915_v13 = vsel %vm914_vm3, %v913_v5, %v908_v9  ;;  %v836_v16 = vadd.f32 1.0, %v1402_v8 }
 0x28c   : > { %v1406_v17 = vpop.eup %1405  ;;  %v927_v18 = vrot.slane %v1404_v12, %v926_v40  ;;  %1421 = vrcp.f32 %v835_v11  ;;  %v922_v22 = vsel %vm921_vm4, %v920_v7, %v915_v13  ;;  %v996_v3 = vsub.s32 %v993_v60, %v1760_v24 }
 0x28d   : > { %v1408_v21 = vpop.eup %1407  ;;  %1423 = vrcp.f32 %v836_v16  ;;  %v837_v23 = vadd.f32 1.0, %v1406_v17 }
 0x28e   : > { %v1410_v25 = vpop.eup %1409  ;;  %v934_v28 = vrot.slane %v1408_v21, %v933_v14  ;;  %v929_v32 = vsel %vm928_vm5, %v927_v18, %v922_v22 }
 0x28f   : > { %v1412_v27 = vpop.eup %1411  ;;  %1425 = vrcp.f32 %v837_v23  ;;  %v838_v30 = vadd.f32 1.0, %v1410_v25 }
 0x290   : > { %v1414_v31 = vpop.eup %1413  ;;  %v941_v33 = vrot.slane %v1412_v27, %v940_v19  ;;  %v936_v37 = vsel %vm935_vm6, %v934_v28, %v929_v32 }
 0x291   : > { %1427 = vrcp.f32 %v838_v30  ;;  %v839_v36 = vadd.f32 1.0, %v1414_v31 }
 0x292   : > { %v1416_v38 = vpop.eup %1415  ;;  %v943_v46 = vsel %vm942_vm7, %v941_v33, %v936_v37 }
 0x293   : > { %v1418_v41 = vpop.eup %1417  ;;  %v948_v43 = vrot.slane %v1416_v38, %v947_v26  ;;  %1429 = vrcp.f32 %v839_v36 }
 0x294   : > { %v1420_v45 = vpop.eup %1419  ;;  %v955_v47 = vrot.slane %v1418_v41, %v954_v34 }
 0x295   : > { %v840_v50 = vadd.f32 1.0, %v1420_v45  ;;  %v950_v54 = vsel %vm949_vm8, %v948_v43, %v943_v46 }
 0x296   : > { %v1422_v42 = vpop.eup %1421  ;;  %v957_v57 = vsel %vm956_vm9, %v955_v47, %v950_v54 }
 0x297   : > { %v1424_v52 = vpop.eup %1423  ;;  %v962_v53 = vrot.slane %v1422_v42, %v961_v44  ;;  %1431 = vrcp.f32 %v840_v50 }
 0x298   : > { %v969_v56 = vrot.slane %v1424_v52, %v968_v48 }
 0x299   : > { %v1426_v59 = vpop.eup %1425  ;;  %v964_v62 = vsel %vm963_vm10, %v962_v53, %v957_v57 }
 0x29a   : > { %v976_v63 = vrot.slane %v1426_v59, %v975_v51  ;;  %v971_v1 = vsel %vm970_vm11, %v969_v56, %v964_v62 }
 0x29b   : > { %v1428_v61 = vpop.eup %1427 }
 0x29c   : > { %v983_v2 = vrot.slane %v1428_v61, %v982_v58  ;;  %v978_v4 = vsel %vm977_vm12, %v976_v63, %v971_v1 }
 0x29d   : > { %v1430_v40 = vpop.eup %1429 }
 0x29e   : > { %v990_v5 = vrot.slane %v1430_v40, %v989_v0  ;;  %v985_v6 = vsel %vm984_vm13, %v983_v2, %v978_v4 }
 0x2a0   : > { %v992_v8 = vsel %vm991_vm14, %v990_v5, %v985_v6 }
 0x2a1   : > { %v1432_v15 = vpop.eup %1431 }
 0x2a2   : > { %v997_v7 = vrot.slane %v1432_v15, %v996_v3 }
 0x2a4   : > { %v999_v24 = vsel %vm998_vm15, %v997_v7, %v992_v8 }
 0x2a5   : > { %1001 = vst [vmem:[%s272_s16] sm:$0x1] %v999_v24 }
 0x2a6   : > { %1446 = shalt.err (!%p1443_p3)
}
 0x2a7   : > { %s1447_s20 = scalar_lea.hbm %s1809_s21, 16  ;;  %s1451_s14 = scalar_lea.hbm %s1858_s7, 32 }
 0x2a8   : > { %p1448_p4 = scmp.ne.s32.totalorder %s1809_s21, %s1447_s20  ;;  %p1452_p9 = scmp.lt.u32.totalorder %s1809_s21, %s1858_s7 }
 0x2a9   : > { %p1453_p10 = scmp.lt.u32.totalorder %s1451_s14, %s1447_s20  ;;  %p1455_p12 = scmp.lt.u32.totalorder %s1447_s20, %s1809_s21 }
 0x2aa   : > { %p1449_p7 = pnand %p1448_p4, %p1576_p5 }
 0x2ab   : > { %p1454_p11 = por %p1453_p10, %p1452_p9 }
 0x2ac   : > { %p1450_p8 = pneg %p1449_p7 }
 0x2ad   : > { %p1456_p13 = por %p1455_p12, %p1454_p11 }
 0x2af   : > { %p1457_p0 = pnand %p1456_p13, %p1450_p8 }
 0x2b1   : > { %1460 = shalt.err (!%p1457_p0)
}
 0x2b2   : > { %1330 = dma.vmem_to_hbm [thread:$0]  (%p1576_p5), %s1811_s17, 16, %s1809_s21, %s1003_s22  }
 0x2b3 PF: > { %p1336_p1 = scmp.ge.s32.totalorder %s1495_s29, 2  ;;  %s1027_s16 = sand.u32 1, %s1483_s26  }
 0x2b4   : > { %s1028_s18 = scalar_lea.sflag [#allocation4], %s1027_s16 }
 0x2b5   : > { %p1333_p2 = pnand %p1336_p1, %p1580_p6 }
 0x2b7   : > { %1478 = dma.done.wait (!%p1333_p2), %s1028_s18, 16  }
 0x2b8   : > { %1480 = vsyncadd (!%p1333_p2), %s1028_s18, 4294967280  ;;  %p18_p3 = scmp.ge.s32.totalorder %s1564_s8, 4   ;;  %s1861_s26 = smov %s1487_s27 }
 0x2b9   : > { %s1862_s27 = smov %s1491_s28  ;;  %s1863_s28 = smov %s1574_s11 }
 0x2ba   : > { %s1864_s29 = smov %s1564_s8  ;;  %20 = sbr.rel (!%p18_p3) target bundleno = 5 (0x5), region = 83 }
 0x2c1   :  { %1032 = vsyncpa [#allocation4], 1 }
 0x2c2   :  { %1034 = vsyncpa [#allocation4 + $0x1], 1 }

</bundles_post_ra>
